<compile_context>
chip_gen: v7x
topology: tpu7x:2x2x1
jax: 0.10.0
libtpu: 0.0.40
codegen_flags: <defaults>
</compile_context>

<pallas_src>
import functools

import jax
import jax.numpy as jnp
from jax.experimental import pallas as pl
from jax.experimental.pallas import tpu as pltpu


# ----------------------------------------------------------------------------
# Pallas kernels: (im2col-matmul with K-grid accumulation) + bias + [residual|
# fused 1x1 shortcut] + [ReLU]
# ----------------------------------------------------------------------------
def _conv_kernel_plain(a_ref, w_ref, b_ref, o_ref, acc_ref, *, apply_relu):
    k = pl.program_id(2)

    @pl.when(k == 0)
    def _():
        acc_ref[...] = jnp.zeros_like(acc_ref)

    acc_ref[...] += jnp.dot(a_ref[...], w_ref[...], preferred_element_type=jnp.float32)

    @pl.when(k == pl.num_programs(2) - 1)
    def _():
        y = acc_ref[...] + b_ref[...]
        if apply_relu:
            y = jnp.maximum(y, 0.0)
        o_ref[...] = y.astype(o_ref.dtype)


def _conv_kernel_residual(a_ref, w_ref, b_ref, r_ref, o_ref, acc_ref, *, apply_relu):
    k = pl.program_id(2)

    @pl.when(k == 0)
    def _():
        acc_ref[...] = jnp.zeros_like(acc_ref)

    acc_ref[...] += jnp.dot(a_ref[...], w_ref[...], preferred_element_type=jnp.float32)

    @pl.when(k == pl.num_programs(2) - 1)
    def _():
        y = acc_ref[...] + b_ref[...] + r_ref[...].astype(jnp.float32)
        if apply_relu:
            y = jnp.maximum(y, 0.0)
        o_ref[...] = y.astype(o_ref.dtype)


def _conv_kernel_shortcut(a_ref, w_ref, b_ref, xs_ref, ws_ref, o_ref, acc_ref, *, apply_relu):
    # Fused 1x1 downsample shortcut: initialize the accumulator with xs @ ws at k == 0.
    k = pl.program_id(2)

    @pl.when(k == 0)
    def _():
        acc_ref[...] = jnp.dot(xs_ref[...], ws_ref[...], preferred_element_type=jnp.float32)

    acc_ref[...] += jnp.dot(a_ref[...], w_ref[...], preferred_element_type=jnp.float32)

    @pl.when(k == pl.num_programs(2) - 1)
    def _():
        y = acc_ref[...] + b_ref[...]          # b_ref already holds bias_conv2 + bias_shortcut
        if apply_relu:
            y = jnp.maximum(y, 0.0)
        o_ref[...] = y.astype(o_ref.dtype)


def _pick_tile(dim, max_tile, align):
    """Largest tile <= max_tile that divides dim and is a multiple of `align`; else full dim."""
    if dim <= max_tile:
        return dim
    for t in range(max_tile, 0, -1):
        if dim % t == 0 and t % align == 0:
            return t
    return dim


def fused_conv_matmul(a, w, bias, residual=None, shortcut=None, relu=True):
    """out = relu?( a @ w + bias (+ residual | + xs @ ws) )

    a: (M, K) bf16, w: (K, N) bf16 (BN scale pre-folded), bias: (N,) f32.
    residual: (M, N) bf16 identity shortcut, or None.
    shortcut: (xs (M, Cin) bf16, ws (Cin, N) bf16) fused 1x1 downsample shortcut, or None.
    """
    assert residual is None or shortcut is None
    M, K = a.shape
    K2, N = w.shape
    assert K == K2

    tm = _pick_tile(M, 256, 8)
    tn = _pick_tile(N, 256, 128)
    tk = _pick_tile(K, 768, 128)
    # Guarantee >=2 "parallel" grid steps so the second TensorCore on v7x has work.
    if (M // tm) * (N // tn) < 2 and tm % 16 == 0:
        tm //= 2
    grid = (M // tm, N // tn, K // tk)

    bias2 = bias.reshape(1, N).astype(jnp.float32)

    in_specs = [
        pl.BlockSpec((tm, tk), lambda i, j, k: (i, k)),   # activations (M,K tiled)
        pl.BlockSpec((tk, tn), lambda i, j, k: (k, j)),   # folded weights (K,N tiled)
        pl.BlockSpec((1, tn), lambda i, j, k: (0, j)),    # bias (f32)
    ]
    args = [a, w, bias2]
    flops = 2 * M * N * K
    bytes_accessed = (a.size * a.dtype.itemsize + w.size * w.dtype.itemsize
                      + M * N * 2 + bias2.size * 4)

    if residual is not None:
        in_specs.append(pl.BlockSpec((tm, tn), lambda i, j, k: (i, j)))
        args.append(residual)
        bytes_accessed += residual.size * residual.dtype.itemsize
        kernel = functools.partial(_conv_kernel_residual, apply_relu=relu)
    elif shortcut is not None:
        xs, ws = shortcut
        cin = xs.shape[1]
        in_specs.append(pl.BlockSpec((tm, cin), lambda i, j, k: (i, 0)))
        in_specs.append(pl.BlockSpec((cin, tn), lambda i, j, k: (0, j)))
        args += [xs, ws]
        flops += 2 * M * N * cin
        bytes_accessed += xs.size * xs.dtype.itemsize + ws.size * ws.dtype.itemsize
        kernel = functools.partial(_conv_kernel_shortcut, apply_relu=relu)
    else:
        kernel = functools.partial(_conv_kernel_plain, apply_relu=relu)

    return pl.pallas_call(
        kernel,
        out_shape=jax.ShapeDtypeStruct((M, N), jnp.bfloat16),
        grid=grid,
        in_specs=in_specs,
        out_specs=pl.BlockSpec((tm, tn), lambda i, j, k: (i, j)),
        scratch_shapes=[pltpu.VMEM((tm, tn), jnp.float32)],
        compiler_params=pltpu.CompilerParams(
            dimension_semantics=("parallel", "parallel", "arbitrary")),
        cost_estimate=pl.CostEstimate(
            flops=int(flops), transcendentals=0, bytes_accessed=int(bytes_accessed)),
    )(*args)


def _head_kernel(x_ref, w_ref, b_ref, o_ref):
    # x_ref: (N, HW, C).  avg_pool2d(4) on a 4x4 map == mean over all 16 positions.
    pooled = jnp.mean(x_ref[...].astype(jnp.float32), axis=1)                # (N, C)
    logits = jnp.dot(pooled, w_ref[...], preferred_element_type=jnp.float32) + b_ref[...]
    m = jnp.max(logits, axis=-1, keepdims=True)
    lse = jnp.log(jnp.sum(jnp.exp(logits - m), axis=-1, keepdims=True)) + m
    o_ref[...] = (logits - lse).astype(o_ref.dtype)                          # log_softmax


def head(x, w, b):
    """x: (N, HW, C) bf16 features before pooling; returns (N, num_classes) f32 log-probs."""
    Nb, HW, C = x.shape
    num_classes = w.shape[1]
    return pl.pallas_call(
        _head_kernel,
        out_shape=jax.ShapeDtypeStruct((Nb, num_classes), jnp.float32),
        grid=(1,),
        in_specs=[
            pl.BlockSpec((Nb, HW, C), lambda i: (0, 0, 0)),
            pl.BlockSpec((C, num_classes), lambda i: (0, 0)),
            pl.BlockSpec((1, num_classes), lambda i: (0, 0)),
        ],
        out_specs=pl.BlockSpec((Nb, num_classes), lambda i: (0, 0)),
    )(x, w, b.reshape(1, num_classes))


# ----------------------------------------------------------------------------
# Plain-JAX glue: im2col, parameter init, BN folding, network wiring
# ----------------------------------------------------------------------------
def im2col_3x3(x, stride):
    """x: (N,H,W,C) NHWC bf16, padding=1. Returns ((N*Ho*Wo, 9*C), (N,Ho,Wo)); K=(kh,kw,C)."""
    xp = jnp.pad(x, ((0, 0), (1, 1), (1, 1), (0, 0)))
    N, Hp, Wp, C = xp.shape
    Ho = (Hp - 3) // stride + 1
    Wo = (Wp - 3) // stride + 1
    cols = []
    for dh in range(3):
        for dw in range(3):
            cols.append(xp[:, dh:dh + stride * (Ho - 1) + 1:stride,
                           dw:dw + stride * (Wo - 1) + 1:stride, :])
    patches = jnp.concatenate(cols, axis=-1)                 # (N,Ho,Wo,9*C) bf16
    return patches.reshape(N * Ho * Wo, 9 * C), (N, Ho, Wo)


def init_conv(key, cin, cout, k):
    fan_in = cin * k * k
    w = jax.random.normal(key, (k, k, cin, cout), jnp.float32) * jnp.sqrt(2.0 / fan_in)
    return w.reshape(k * k * cin, cout)                      # (K, Cout), K order=(kh,kw,Cin)


def init_bn(c):
    return dict(gamma=jnp.ones((c,), jnp.float32), beta=jnp.zeros((c,), jnp.float32),
                mean=jnp.zeros((c,), jnp.float32), var=jnp.ones((c,), jnp.float32))


def _fold_bn(w_f32, bn, eps=1e-5):
    """Eval-mode BN folded into the conv weight; returns (bf16 weight, f32 bias)."""
    scale = bn["gamma"] / jnp.sqrt(bn["var"] + eps)
    bias = bn["beta"] - bn["mean"] * scale
    return (w_f32 * scale[None, :]).astype(jnp.bfloat16), bias.astype(jnp.float32)


def init_resnet(key, num_blocks=(2, 2, 2, 2), num_classes=10):
    keys = iter(jax.random.split(key, 128))
    params = {"conv1": init_conv(next(keys), 3, 64, 3), "bn1": init_bn(64)}
    in_planes = 64
    layers = []
    for planes, nb, stride0 in zip((64, 128, 256, 512), num_blocks, (1, 2, 2, 2)):
        blocks = []
        for s in [stride0] + [1] * (nb - 1):
            blk = dict(
                stride=s,
                conv1=init_conv(next(keys), in_planes, planes, 3), bn1=init_bn(planes),
                conv2=init_conv(next(keys), planes, planes, 3), bn2=init_bn(planes),
            )
            if s != 1 or in_planes != planes:
                blk["sc_conv"] = init_conv(next(keys), in_planes, planes, 1)
                blk["sc_bn"] = init_bn(planes)
            blocks.append(blk)
            in_planes = planes
        layers.append(blocks)
    params["layers"] = layers
    params["linear_w"] = jax.random.normal(next(keys), (512, num_classes), jnp.float32) * 0.05
    params["linear_b"] = jnp.zeros((num_classes,), jnp.float32)
    return params


def prepare_params(raw):
    """Fold BN scales into bf16 conv weights; combine biases for fused shortcuts."""
    p = {}
    p["w1"], p["b1"] = _fold_bn(raw["conv1"], raw["bn1"])
    layers = []
    for layer in raw["layers"]:
        blocks = []
        for blk in layer:
            w1, b1 = _fold_bn(blk["conv1"], blk["bn1"])
            w2, b2 = _fold_bn(blk["conv2"], blk["bn2"])
            nb = dict(stride=blk["stride"], w1=w1, b1=b1, w2=w2, b2=b2)
            if "sc_conv" in blk:
                wsc, bsc = _fold_bn(blk["sc_conv"], blk["sc_bn"])
                nb["w_sc"] = wsc
                nb["b2"] = b2 + bsc            # single combined bias in the fused epilogue
            blocks.append(nb)
        layers.append(blocks)
    p["layers"] = layers
    p["linear_w"] = raw["linear_w"].astype(jnp.float32)
    p["linear_b"] = raw["linear_b"].astype(jnp.float32)
    return p


def basic_block(x_nhwc, blk):
    N, H, W, C = x_nhwc.shape
    s = blk["stride"]
    # conv1 -> (folded BN) -> relu
    a1, (Nn, Ho, Wo) = im2col_3x3(x_nhwc, s)
    out1 = fused_conv_matmul(a1, blk["w1"], blk["b1"], relu=True)
    out1_nhwc = out1.reshape(Nn, Ho, Wo, -1)
    # conv2 -> (folded BN) -> + shortcut -> relu, shortcut fused in-kernel
    a2, _ = im2col_3x3(out1_nhwc, 1)
    if "w_sc" in blk:
        xs = x_nhwc[:, ::s, ::s, :].reshape(Nn * Ho * Wo, C)
        out2 = fused_conv_matmul(a2, blk["w2"], blk["b2"],
                                 shortcut=(xs, blk["w_sc"]), relu=True)
    else:
        residual = x_nhwc.reshape(N * H * W, C)
        out2 = fused_conv_matmul(a2, blk["w2"], blk["b2"],
                                 residual=residual, relu=True)
    return out2.reshape(Nn, Ho, Wo, -1)


def resnet_forward(params, x_nchw):
    x = jnp.transpose(x_nchw, (0, 2, 3, 1)).astype(jnp.bfloat16)   # NCHW -> NHWC bf16
    a, (N, Ho, Wo) = im2col_3x3(x, 1)
    out = fused_conv_matmul(a, params["w1"], params["b1"], relu=True).reshape(N, Ho, Wo, 64)
    for layer in params["layers"]:
        for blk in layer:
            out = basic_block(out, blk)
    N, H, W, C = out.shape                                          # (N, 4, 4, 512) for 32x32 input
    return head(out.reshape(N, H * W, C), params["linear_w"], params["linear_b"])


# ----------------------------------------------------------------------------
if __name__ == "__main__":
    key = jax.random.PRNGKey(0)
    k_params, k_x = jax.random.split(key)
    raw_params = init_resnet(k_params, num_blocks=(2, 2, 2, 2), num_classes=10)
    params = prepare_params(raw_params)
    # CIFAR-sized input (spatial must be 32 so layer4 output is 4x4, matching avg_pool2d(4)).
    x = jax.random.normal(k_x, (2, 3, 32, 32), jnp.float32)

    logp = resnet_forward(params, x)
    jax.block_until_ready(logp)

    assert logp.shape == (2, 10)
    assert bool(jnp.all(jnp.isfinite(logp)))
    # log_softmax rows should exponentiate-and-sum to ~1
    assert bool(jnp.allclose(jnp.exp(logp).sum(axis=1), 1.0, atol=1e-3))
    print("KERNEL_OK")
</pallas_src>

<mosaic_0001>
module attributes {stable_mosaic.version = 11 : i64} {
  func.func @_conv_kernel_plain(%arg0: i32, %arg1: i32, %arg2: i32, %arg3: memref<256x27xbf16, #tpu.memory_space<vmem>>, %arg4: memref<27x64xbf16, #tpu.memory_space<vmem>>, %arg5: memref<1x64xf32, #tpu.memory_space<vmem>>, %arg6: memref<256x64xbf16, #tpu.memory_space<vmem>>, %arg7: memref<256x64xf32, #tpu.memory_space<vmem>>) attributes {dimension_semantics = [#tpu.dimension_semantics<parallel>, #tpu.dimension_semantics<parallel>, #tpu.dimension_semantics<arbitrary>], iteration_bounds = array<i64: 8, 1, 1>, scalar_prefetch = 0 : i64, scratch_operands = 1 : i64, tpu.core_type = #tpu.core_type<tc>, window_params = [{transform_indices = @transform_0, window_bounds = array<i64: 256, 27>}, {transform_indices = @transform_1, window_bounds = array<i64: 27, 64>}, {transform_indices = @transform_2, window_bounds = array<i64: 1, 64>}, {transform_indices = @transform_3, window_bounds = array<i64: 256, 64>}]} {
    %c0_i32 = arith.constant 0 : i32
    %0 = arith.cmpi eq, %arg2, %c0_i32 : i32
    %1 = arith.extui %0 : i1 to i32
    %c0_i32_0 = arith.constant 0 : i32
    %2 = arith.cmpi ne, %1, %c0_i32_0 : i32
    scf.if %2 {
      %cst_10 = arith.constant 0.000000e+00 : f32
      %12 = vector.broadcast %cst_10 : f32 to vector<256x64xf32>
      %c0_11 = arith.constant 0 : index
      %c0_12 = arith.constant 0 : index
      %13 = vector.load %arg7[%c0_11, %c0_12] : memref<256x64xf32, #tpu.memory_space<vmem>>, vector<256x64xf32>
      tpu.vector_store %arg7[%c0_11, %c0_12], %12 {strides = array<i32>} : memref<256x64xf32, #tpu.memory_space<vmem>>, vector<256x64xf32>,
    } else {
    }
    %c0 = arith.constant 0 : index
    %c0_1 = arith.constant 0 : index
    %3 = vector.load %arg7[%c0, %c0_1] : memref<256x64xf32, #tpu.memory_space<vmem>>, vector<256x64xf32>
    %c0_2 = arith.constant 0 : index
    %c0_3 = arith.constant 0 : index
    %4 = vector.load %arg3[%c0_2, %c0_3] : memref<256x27xbf16, #tpu.memory_space<vmem>>, vector<256x27xbf16>
    %c0_4 = arith.constant 0 : index
    %c0_5 = arith.constant 0 : index
    %5 = vector.load %arg4[%c0_4, %c0_5] : memref<27x64xbf16, #tpu.memory_space<vmem>>, vector<27x64xbf16>
    %cst = arith.constant dense<0.000000e+00> : vector<256x64xf32>
    %6 = tpu.matmul %4, %5, %cst {dimension_numbers = #tpu.dot_dimension_numbers<[1], [0], [0], [1], [0, 0, 1, 1], [], []>} : vector<256x27xbf16>, vector<27x64xbf16>, vector<256x64xf32> -> vector<256x64xf32>
    %7 = arith.addf %3, %6 : vector<256x64xf32>
    %c0_6 = arith.constant 0 : index
    %c0_7 = arith.constant 0 : index
    %8 = vector.load %arg7[%c0_6, %c0_7] : memref<256x64xf32, #tpu.memory_space<vmem>>, vector<256x64xf32>
    tpu.vector_store %arg7[%c0_6, %c0_7], %7 {strides = array<i32>} : memref<256x64xf32, #tpu.memory_space<vmem>>, vector<256x64xf32>,
    %c0_i32_8 = arith.constant 0 : i32
    %9 = arith.cmpi eq, %arg2, %c0_i32_8 : i32
    %10 = arith.extui %9 : i1 to i32
    %c0_i32_9 = arith.constant 0 : i32
    %11 = arith.cmpi ne, %10, %c0_i32_9 : i32
    scf.if %11 {
      %c0_10 = arith.constant 0 : index
      %c0_11 = arith.constant 0 : index
      %12 = vector.load %arg7[%c0_10, %c0_11] : memref<256x64xf32, #tpu.memory_space<vmem>>, vector<256x64xf32>
      %c0_12 = arith.constant 0 : index
      %c0_13 = arith.constant 0 : index
      %13 = vector.load %arg5[%c0_12, %c0_13] : memref<1x64xf32, #tpu.memory_space<vmem>>, vector<1x64xf32>
      %14 = vector.broadcast %13 : vector<1x64xf32> to vector<256x64xf32>
      %15 = arith.addf %12, %14 : vector<256x64xf32>
      %cst_14 = arith.constant 0.000000e+00 : f32
      %16 = vector.broadcast %cst_14 : f32 to vector<256x64xf32>
      %17 = arith.maximumf %15, %16 : vector<256x64xf32>
      %18 = arith.truncf %17 : vector<256x64xf32> to vector<256x64xbf16>
      %c0_15 = arith.constant 0 : index
      %c0_16 = arith.constant 0 : index
      %19 = vector.load %arg6[%c0_15, %c0_16] : memref<256x64xbf16, #tpu.memory_space<vmem>>, vector<256x64xbf16>
      tpu.vector_store %arg6[%c0_15, %c0_16], %18 {strides = array<i32>} : memref<256x64xbf16, #tpu.memory_space<vmem>>, vector<256x64xbf16>,
    } else {
    }
    return
  }
  func.func @transform_0(%arg0: i32, %arg1: i32, %arg2: i32) -> (i32, i32) {
    %c0_i32 = arith.constant 0 : i32
    return %arg0, %arg2 : i32, i32
  }
  func.func @transform_1(%arg0: i32, %arg1: i32, %arg2: i32) -> (i32, i32) {
    %c0_i32 = arith.constant 0 : i32
    return %arg2, %arg1 : i32, i32
  }
  func.func @transform_2(%arg0: i32, %arg1: i32, %arg2: i32) -> (i32, i32) {
    %c0_i32 = arith.constant 0 : i32
    %c0_i32_0 = arith.constant 0 : i32
    return %c0_i32, %arg1 : i32, i32
  }
  func.func @transform_3(%arg0: i32, %arg1: i32, %arg2: i32) -> (i32, i32) {
    %c0_i32 = arith.constant 0 : i32
    return %arg0, %arg1 : i32, i32
  }
}

</mosaic_0001>

<bundles_post_ra>
// kernel: tpu_custom_call.1
= control target key start
LH: loop header
LB: loop body
LE: loop exit
PB: predicated region body
PF: predicated region fallthrough
CT: control target
= control target key end

     0   :  { %s1376_s12 = smov 0   ;;  %s1378_s13 = smov 0   ;;  %s1636_s0 = inlined_call_operand.vmem [shape: bf16[2048,27], index: 0, kind: input, shape index: {}]   ;;  %s1637_s1 = inlined_call_operand.vmem [shape: bf16[27,64], index: 1, kind: input, shape index: {}]   ;;  %s1638_s2 = inlined_call_operand.vmem [shape: f32[1,64], index: 2, kind: input, shape index: {}]   ;;  %s1639_s3 = inlined_call_operand.vmem [shape: bf16[2048,64], index: 3, kind: output, shape index: {}]  }
   0x1   :  { %s1380_s14 = smov 0  }
   0x2 LB: > { %s32_s15 = sadd.s32 1, %s1348_s13  ;;  %p1122_p0 = scmp.ge.s32.totalorder %s1352_s14, 1  ;;  %s1352_s14 = sphi %s1380_s14, %s13_s14   ;;  %s1348_s13 = sphi %s1378_s13, %s1642_s13   ;;  %s1344_s12 = sphi %s1376_s12, %s1641_s12  }
   0x3   : > { %p34_p1 = scmp.ge.s32.totalorder %s32_s15, 8  ;;  %p188_p2 = scmp.lt.s32.totalorder %s1352_s14, 9 }
   0x5   : > { %s1644_s15 = smov (%p34_p1, %s32_s15), 0  ;;  %p189_p3 = pnand %p1122_p0, %p188_p2 }
   0x6   : > { %v1312_v0 = vld [vmem:[%s1637_s1] sm:$0xff] (!%p189_p3)   ;;  %vm505_vm0 = vcmask (!%p189_p3), 1044480   ;;  %v1313_v1 = vld [vmem:[%s1637_s1 + $0x8] sm:$0x3f] (!%p189_p3)   ;;  %vm506_vm1 = vcmask (!%p189_p3), 1045504   ;;  %s1123_s20 = sshll.u32 (!%p189_p3), %s1344_s12, 5 }
   0x7   : > { %192 = sbr.rel (%p189_p3) target bundleno = 281 (0x119), region = 32  ;;  %1246 = vmatprep.subr.bf16.mxu0 (!%p189_p3), %v1312_v0  ;;  %1282 = vmatprep.subr.bf16.mxu1 (!%p189_p3), %v1312_v0  ;;  %vm264_vm2 = vcmask (!%p189_p3), 523264   ;;  %v1354_v2 = vmov (!%p189_p3), 65535   ;;  %p1405_p4 = scmp.lt.s32.totalorder (!%p189_p3), %s1123_s20, 255  ;;  %v1355_v5 = vmov (!%p189_p3), 0.0   ;;  %vm456_vm3 = vcmask (!%p189_p3), 220160  }
   0x8   : > { %1247 = vmatpush3.bf16.msra.mxu0 (!%p189_p3), %v1312_v0  ;;  %1284 = vmatpush3.bf16.msra.mxu1 (!%p189_p3), %v1312_v0  ;;  %v507_v3 = vsel (!%p189_p3), %vm505_vm0, 4294967295, %v1354_v2  ;;  %267 = vst.msk [vmem:[#allocation2 + $0x10] sm:$0xff] (!%p189_p3), %vm264_vm2, %v1355_v5  ;;  %265 = vst.msk [vmem:[#allocation2] sm:$0xff] (!%p189_p3), %vm264_vm2, %v1355_v5  ;;  %v1498_v50 = vld [vmem:[%s1638_s2] ss:$0 sm:$0xff] (!%p189_p3)  ;;  %vm972_vm4 = vcmask (!%p189_p3), 519168  }
   0x9   : > { %v508_v4 = vsel (!%p189_p3), %vm506_vm1, %v507_v3, 0  ;;  %266 = vst.msk [vmem:[#allocation2 + $0x8] sm:$0xff] (!%p189_p3), %vm264_vm2, %v1355_v5  ;;  %268 = vst.msk [vmem:[#allocation2 + $0x18] sm:$0xff] (!%p189_p3), %vm264_vm2, %v1355_v5 }
   0xa   : > { %269 = vst.msk [vmem:[#allocation2 + $0x20] sm:$0xff] (!%p189_p3), %vm264_vm2, %v1355_v5  ;;  %270 = vst.msk [vmem:[#allocation2 + $0x28] sm:$0xff] (!%p189_p3), %vm264_vm2, %v1355_v5  ;;  %v510_v6 = vand.u32 (!%p189_p3), %v1313_v1, %v508_v4 }
   0xb   : > { %271 = vst.msk [vmem:[#allocation2 + $0x30] sm:$0xff] (!%p189_p3), %vm264_vm2, %v1355_v5  ;;  %272 = vst.msk [vmem:[#allocation2 + $0x38] sm:$0xff] (!%p189_p3), %vm264_vm2, %v1355_v5 }
   0xc   : > { %273 = vst.msk [vmem:[#allocation2 + $0x40] sm:$0xff] (!%p189_p3), %vm264_vm2, %v1355_v5  ;;  %274 = vst.msk [vmem:[#allocation2 + $0x48] sm:$0xff] (!%p189_p3), %vm264_vm2, %v1355_v5  ;;  %1248 = vmatprep.subr.bf16.mxu0 (!%p189_p3), %v510_v6  ;;  %1283 = vmatprep.subr.bf16.mxu1 (!%p189_p3), %v510_v6 }
   0xd   : > { %275 = vst.msk [vmem:[#allocation2 + $0x50] sm:$0xff] (!%p189_p3), %vm264_vm2, %v1355_v5  ;;  %276 = vst.msk [vmem:[#allocation2 + $0x58] sm:$0xff] (!%p189_p3), %vm264_vm2, %v1355_v5  ;;  %1249 = vmatpush3.bf16.msra.mxu0 (!%p189_p3), %v510_v6  ;;  %1285 = vmatpush3.bf16.msra.mxu1 (!%p189_p3), %v510_v6 }
   0xe   : > { %277 = vst.msk [vmem:[#allocation2 + $0x60] sm:$0xff] %vm264_vm2, %v1355_v5  ;;  %278 = vst.msk [vmem:[#allocation2 + $0x68] sm:$0xff] %vm264_vm2, %v1355_v5  ;;  %s1646_s20 = smov (!%p1405_p4, %s1123_s20), 255 }
   0xf   : > { %279 = vst.msk [vmem:[#allocation2 + $0x70] sm:$0xff] %vm264_vm2, %v1355_v5  ;;  %280 = vst.msk [vmem:[#allocation2 + $0x78] sm:$0xff] %vm264_vm2, %v1355_v5  ;;  %s1124_s22 = sshll.u32 %s1646_s20, 2  ;;  %v299_v23 = vld [vmem:[#allocation2 + $0x10] sm:$0xff]  ;;  %v297_v25 = vld [vmem:[#allocation2] sm:$0xff] }
  0x10   : > { %281 = vst.msk [vmem:[#allocation2 + $0x80] sm:$0xff] %vm264_vm2, %v1355_v5  ;;  %282 = vst.msk [vmem:[#allocation2 + $0x88] sm:$0xff] %vm264_vm2, %v1355_v5  ;;  %s1453_s25 = scalar_lea.vmem %s1636_s0, %s1124_s22  ;;  %v300_v28 = vld [vmem:[#allocation2 + $0x18] sm:$0xff]  ;;  %v298_v33 = vld [vmem:[#allocation2 + $0x8] sm:$0xff]  ;;  %s1515_s30 = scalar_lea.vmem %s1639_s3, %s1124_s22 }
  0x11   : > { %283 = vst.msk [vmem:[#allocation2 + $0x90] sm:$0xff] %vm264_vm2, %v1355_v5  ;;  %284 = vst.msk [vmem:[#allocation2 + $0x98] sm:$0xff] %vm264_vm2, %v1355_v5  ;;  %v1314_v7 = vld [vmem:[%s1453_s25] sm:$0xff]   ;;  %v1316_v9 = vld [vmem:[%s1453_s25 + $0x8] sm:$0xff]  }
  0x12   : > { %285 = vst.msk [vmem:[#allocation2 + $0xa0] sm:$0xff] %vm264_vm2, %v1355_v5  ;;  %286 = vst.msk [vmem:[#allocation2 + $0xa8] sm:$0xff] %vm264_vm2, %v1355_v5  ;;  %v1315_v8 = vld [vmem:[%s1453_s25 + $0x40] sm:$0xff]   ;;  %1250 = vmatprep.mubr.msk.bf16.mxu0 %vm456_vm3, %v1314_v7  ;;  %v1317_v10 = vld [vmem:[%s1453_s25 + $0x48] sm:$0xff]  }
  0x13   : > { %287 = vst.msk [vmem:[#allocation2 + $0xb0] sm:$0xff] %vm264_vm2, %v1355_v5  ;;  %288 = vst.msk [vmem:[#allocation2 + $0xb8] sm:$0xff] %vm264_vm2, %v1355_v5  ;;  %1266 = vmatprep.mubr.msk.bf16.mxu1 %vm456_vm3, %v1315_v8  ;;  %1251 = vmatmul.mubr.msk.bf16.vlgmr.msra.gmra.mrb[0].mxu0 %vm456_vm3, %v1316_v9  ;;  %v1318_v11 = vld [vmem:[%s1453_s25 + $0x10] sm:$0xff]   ;;  %v1320_v13 = vld [vmem:[%s1453_s25 + $0x18] sm:$0xff]  }
  0x14   : > { %289 = vst.msk [vmem:[#allocation2 + $0xc0] sm:$0xff] %vm264_vm2, %v1355_v5  ;;  %290 = vst.msk [vmem:[#allocation2 + $0xc8] sm:$0xff] %vm264_vm2, %v1355_v5  ;;  %1267 = vmatmul.mubr.msk.bf16.vlgmr.msra.gmra.mrb[0].mxu1 %vm456_vm3, %v1317_v10  ;;  %v1319_v12 = vld [vmem:[%s1453_s25 + $0x50] sm:$0xff]   ;;  %1254 = vmatprep.mubr.msk.bf16.mxu0 %vm456_vm3, %v1318_v11  ;;  %v1321_v14 = vld [vmem:[%s1453_s25 + $0x58] sm:$0xff]  }
  0x15   : > { %291 = vst.msk [vmem:[#allocation2 + $0xd0] sm:$0xff] %vm264_vm2, %v1355_v5  ;;  %292 = vst.msk [vmem:[#allocation2 + $0xd8] sm:$0xff] %vm264_vm2, %v1355_v5  ;;  %1270 = vmatprep.mubr.msk.bf16.mxu1 %vm456_vm3, %v1319_v12  ;;  %v1322_v15 = vld [vmem:[%s1453_s25 + $0x20] sm:$0xff]   ;;  %v1324_v17 = vld [vmem:[%s1453_s25 + $0x28] sm:$0xff]  }
  0x16   : > { %293 = vst.msk [vmem:[#allocation2 + $0xe0] sm:$0xff] %vm264_vm2, %v1355_v5  ;;  %294 = vst.msk [vmem:[#allocation2 + $0xe8] sm:$0xff] %vm264_vm2, %v1355_v5  ;;  %v1323_v16 = vld [vmem:[%s1453_s25 + $0x60] sm:$0xff]   ;;  %v1325_v18 = vld [vmem:[%s1453_s25 + $0x68] sm:$0xff]  }
  0x17   : > { %295 = vst.msk [vmem:[#allocation2 + $0xf0] sm:$0xff] %vm264_vm2, %v1355_v5  ;;  %296 = vst.msk [vmem:[#allocation2 + $0xf8] sm:$0xff] %vm264_vm2, %v1355_v5  ;;  %v1326_v19 = vld [vmem:[%s1453_s25 + $0x30] sm:$0xff]   ;;  %v1328_v21 = vld [vmem:[%s1453_s25 + $0x38] sm:$0xff]  }
  0x18   : > { %v1327_v20 = vld [vmem:[%s1453_s25 + $0x70] sm:$0xff]   ;;  %v1329_v22 = vld [vmem:[%s1453_s25 + $0x78] sm:$0xff]   ;;  %v313_v27 = vld [vmem:[#allocation2 + $0x80] sm:$0xff] }
  0x19   : > { %v315_v24 = vld [vmem:[#allocation2 + $0x90] sm:$0xff]  ;;  %v316_v32 = vld [vmem:[#allocation2 + $0x98] sm:$0xff]  ;;  %v314_v38 = vld [vmem:[#allocation2 + $0x88] sm:$0xff] }
  0x1a   : > { %v303_v47 = vld [vmem:[#allocation2 + $0x30] sm:$0xff]  ;;  %v301_v49 = vld [vmem:[#allocation2 + $0x20] sm:$0xff]  ;;  %v304_v53 = vld [vmem:[#allocation2 + $0x38] sm:$0xff] }
  0x1b   : > { %1255 = vmatmul.mubr.msk.bf16.gmra.mrb[4].mxu0 %vm456_vm3, %v1320_v13  ;;  %v319_v48 = vld [vmem:[#allocation2 + $0xb0] sm:$0xff]  ;;  %v317_v52 = vld [vmem:[#allocation2 + $0xa0] sm:$0xff]  ;;  %v320_v57 = vld [vmem:[#allocation2 + $0xb8] sm:$0xff] }
  0x1c   : > { %1271 = vmatmul.mubr.msk.bf16.gmra.mrb[4].mxu1 %vm456_vm3, %v1321_v14  ;;  %1258 = vmatprep.mubr.msk.bf16.mxu0 %vm456_vm3, %v1322_v15  ;;  %v302_v58 = vld [vmem:[#allocation2 + $0x28] sm:$0xff] }
  0x1d   : > { %1274 = vmatprep.mubr.msk.bf16.mxu1 %vm456_vm3, %v1323_v16  ;;  %v318_v0 = vld [vmem:[#allocation2 + $0xa8] sm:$0xff] }
  0x23   : > { %1259 = vmatmul.mubr.msk.bf16.gmra.mrb[8].mxu0 %vm456_vm3, %v1324_v17 }
  0x24   : > { %1275 = vmatmul.mubr.msk.bf16.gmra.mrb[8].mxu1 %vm456_vm3, %v1325_v18  ;;  %1262 = vmatprep.mubr.msk.bf16.mxu0 %vm456_vm3, %v1326_v19 }
  0x25   : > { %1278 = vmatprep.mubr.msk.bf16.mxu1 %vm456_vm3, %v1327_v20 }
  0x2b   : > { %1263 = vmatmul.mubr.msk.bf16.gmra.mrb[12].mxu0 %vm456_vm3, %v1328_v21 }
  0x2c   : > { %1279 = vmatmul.mubr.msk.bf16.gmra.mrb[12].mxu1 %vm456_vm3, %v1329_v22 }
  0xe6   : > { %v1252_v26 = vpop.f32.mrb[0].mxu0 }
  0xe7   : > { %v675_v29 = vadd.f32 %v1252_v26, %v299_v23  ;;  %v1268_v30 = vpop.f32.mrb[0].mxu1  ;;  %v546_v31 = vpop.f32.mrb[1].mxu0  ;;  %v307_v26 = vld [vmem:[#allocation2 + $0x50] sm:$0xff] }
  0xe8   : > { %v691_v34 = vadd.f32 %v1268_v30, %v315_v24  ;;  %v673_v35 = vadd.f32 %v546_v31, %v297_v25  ;;  %v610_v36 = vpop.f32.mrb[1].mxu1  ;;  %v1253_v37 = vpop.f32.mrb[2].mxu0  ;;  %v323_v31 = vld [vmem:[#allocation2 + $0xd0] sm:$0xff] }
  0xe9   : > { %708 = vst.msk [vmem:[#allocation2 + $0x10] sm:$0xff] %vm264_vm2, %v675_v29  ;;  %v689_v39 = vadd.f32 %v610_v36, %v313_v27  ;;  %v676_v40 = vadd.f32 %v1253_v37, %v300_v28  ;;  %v1269_v41 = vpop.f32.mrb[2].mxu1  ;;  %v549_v42 = vpop.f32.mrb[3].mxu0 }
  0xea   : > { %724 = vst.msk [vmem:[#allocation2 + $0x90] sm:$0xff] %vm264_vm2, %v691_v34  ;;  %706 = vst.msk [vmem:[#allocation2] sm:$0xff] %vm264_vm2, %v673_v35  ;;  %v692_v43 = vadd.f32 %v1269_v41, %v316_v32  ;;  %v674_v44 = vadd.f32 %v549_v42, %v298_v33  ;;  %v613_v45 = vpop.f32.mrb[3].mxu1  ;;  %v305_v32 = vld [vmem:[#allocation2 + $0x40] sm:$0xff] }
  0xeb   : > { %722 = vst.msk [vmem:[#allocation2 + $0x80] sm:$0xff] %vm264_vm2, %v689_v39  ;;  %709 = vst.msk [vmem:[#allocation2 + $0x18] sm:$0xff] %vm264_vm2, %v676_v40  ;;  %v690_v46 = vadd.f32 %v613_v45, %v314_v38  ;;  %v321_v38 = vld [vmem:[#allocation2 + $0xc0] sm:$0xff]  ;;  %v308_v39 = vld [vmem:[#allocation2 + $0x58] sm:$0xff] }
  0xec   : > { %725 = vst.msk [vmem:[#allocation2 + $0x98] sm:$0xff] %vm264_vm2, %v692_v43  ;;  %707 = vst.msk [vmem:[#allocation2 + $0x8] sm:$0xff] %vm264_vm2, %v674_v44 }
  0xed   : > { %723 = vst.msk [vmem:[#allocation2 + $0x88] sm:$0xff] %vm264_vm2, %v690_v46  ;;  %v324_v46 = vld [vmem:[#allocation2 + $0xd8] sm:$0xff] }
  0xee   : > { %v1256_v51 = vpop.f32.mrb[4].mxu0 }
  0xef   : > { %v679_v54 = vadd.f32 %v1256_v51, %v303_v47  ;;  %v1272_v55 = vpop.f32.mrb[4].mxu1  ;;  %v562_v56 = vpop.f32.mrb[5].mxu0  ;;  %v306_v47 = vld [vmem:[#allocation2 + $0x48] sm:$0xff] }
  0xf0   : > { %v743_v59 = vld [vmem:[#allocation2 + $0x10] sm:$0xff]  ;;  %v695_v60 = vadd.f32 %v1272_v55, %v319_v48  ;;  %v677_v61 = vadd.f32 %v562_v56, %v301_v49  ;;  %v626_v62 = vpop.f32.mrb[5].mxu1  ;;  %v1257_v63 = vpop.f32.mrb[6].mxu0  ;;  %v322_v56 = vld [vmem:[#allocation2 + $0xc8] sm:$0xff] }
  0xf1   : > { %v782_v1 = vadd.f32 %v1498_v50, %v743_v59  ;;  %v759_v2 = vld [vmem:[#allocation2 + $0x90] sm:$0xff]  ;;  %v741_v3 = vld [vmem:[#allocation2] sm:$0xff]  ;;  %712 = vst.msk [vmem:[#allocation2 + $0x30] sm:$0xff] %vm264_vm2, %v679_v54  ;;  %v693_v4 = vadd.f32 %v626_v62, %v317_v52  ;;  %v680_v5 = vadd.f32 %v1257_v63, %v304_v53  ;;  %v1273_v6 = vpop.f32.mrb[6].mxu1  ;;  %v565_v7 = vpop.f32.mrb[7].mxu0 }
  0xf2   : > { %v798_v8 = vadd.f32 %v1498_v50, %v759_v2  ;;  %v780_v9 = vadd.f32 %v1498_v50, %v741_v3  ;;  %v757_v10 = vld [vmem:[#allocation2 + $0x80] sm:$0xff]  ;;  %v744_v11 = vld [vmem:[#allocation2 + $0x18] sm:$0xff]  ;;  %728 = vst.msk [vmem:[#allocation2 + $0xb0] sm:$0xff] %vm264_vm2, %v695_v60  ;;  %710 = vst.msk [vmem:[#allocation2 + $0x20] sm:$0xff] %vm264_vm2, %v677_v61  ;;  %v696_v12 = vadd.f32 %v1273_v6, %v320_v57  ;;  %v629_v14 = vpop.f32.mrb[7].mxu1 }
  0xf3   : > { %v678_v13 = vadd.f32 %v565_v7, %v302_v58  ;;  %v814_v15 = vmax.f32 %v782_v1, 0.0  ;;  %v796_v16 = vadd.f32 %v1498_v50, %v757_v10  ;;  %v783_v17 = vadd.f32 %v1498_v50, %v744_v11  ;;  %v760_v18 = vld [vmem:[#allocation2 + $0x98] sm:$0xff]  ;;  %v742_v19 = vld [vmem:[#allocation2 + $0x8] sm:$0xff]  ;;  %726 = vst.msk [vmem:[#allocation2 + $0xa0] sm:$0xff] %vm264_vm2, %v693_v4  ;;  %713 = vst.msk [vmem:[#allocation2 + $0x38] sm:$0xff] %vm264_vm2, %v680_v5 }
  0xf4   : > { %v694_v20 = vadd.f32 %v629_v14, %v318_v0  ;;  %v830_v21 = vmax.f32 %v798_v8, 0.0  ;;  %v812_v22 = vmax.f32 %v780_v9, 0.0  ;;  %v799_v23 = vadd.f32 %v1498_v50, %v760_v18  ;;  %v758_v25 = vld [vmem:[#allocation2 + $0x88] sm:$0xff]  ;;  %729 = vst.msk [vmem:[#allocation2 + $0xb8] sm:$0xff] %vm264_vm2, %v696_v12 }
  0xf5   : > { %v781_v24 = vadd.f32 %v1498_v50, %v742_v19  ;;  %711 = vst.msk [vmem:[#allocation2 + $0x28] sm:$0xff] %vm264_vm2, %v678_v13  ;;  %v1198_v27 = vpack.c.bf16 %v814_v15, %v814_v15  ;;  %v828_v28 = vmax.f32 %v796_v16, 0.0  ;;  %v815_v29 = vmax.f32 %v783_v17, 0.0  ;;  %v311_v19 = vld [vmem:[#allocation2 + $0x70] sm:$0xff] }
  0xf6   : > { %v797_v30 = vadd.f32 %v1498_v50, %v758_v25  ;;  %727 = vst.msk [vmem:[#allocation2 + $0xa8] sm:$0xff] %vm264_vm2, %v694_v20  ;;  %v1214_v33 = vpack.c.bf16 %v830_v21, %v830_v21  ;;  %v1196_v34 = vpack.c.bf16 %v812_v22, %v812_v22  ;;  %v831_v35 = vmax.f32 %v799_v23, 0.0  ;;  %v1260_v37 = vpop.f32.mrb[8].mxu0  ;;  %v309_v25 = vld [vmem:[#allocation2 + $0x60] sm:$0xff] }
  0xf7   : > { %v813_v36 = vmax.f32 %v781_v24, 0.0  ;;  %975 = vst.msk [vmem:[%s1515_s30 + $0x8] sm:$0xf] %vm972_vm4, %v1198_v27  ;;  %v1212_v40 = vpack.c.bf16 %v828_v28, %v828_v28  ;;  %v1199_v41 = vpack.c.bf16 %v815_v29, %v815_v29  ;;  %v683_v43 = vadd.f32 %v1260_v37, %v307_v26  ;;  %v1276_v44 = vpop.f32.mrb[8].mxu1  ;;  %v578_v45 = vpop.f32.mrb[9].mxu0  ;;  %v327_v24 = vld [vmem:[#allocation2 + $0xf0] sm:$0xff] }
  0xf8   : > { %v829_v42 = vmax.f32 %v797_v30, 0.0  ;;  %991 = vst.msk [vmem:[%s1515_s30 + $0x48] sm:$0xf] %vm972_vm4, %v1214_v33  ;;  %973 = vst.msk [vmem:[%s1515_s30] sm:$0xf] %vm972_vm4, %v1196_v34  ;;  %v1215_v48 = vpack.c.bf16 %v831_v35, %v831_v35  ;;  %v747_v51 = vld [vmem:[#allocation2 + $0x30] sm:$0xff]  ;;  %v699_v52 = vadd.f32 %v1276_v44, %v323_v31  ;;  %v681_v53 = vadd.f32 %v578_v45, %v305_v32 }
  0xf9   : > { %v1197_v49 = vpack.c.bf16 %v813_v36, %v813_v36  ;;  %v642_v54 = vpop.f32.mrb[9].mxu1  ;;  %v1261_v55 = vpop.f32.mrb[10].mxu0  ;;  %989 = vst.msk [vmem:[%s1515_s30 + $0x40] sm:$0xf] %vm972_vm4, %v1212_v40  ;;  %976 = vst.msk [vmem:[%s1515_s30 + $0xc] sm:$0xf] %vm972_vm4, %v1199_v41  ;;  %v786_v58 = vadd.f32 %v1498_v50, %v747_v51 }
  0xfa   : > { %v1213_v57 = vpack.c.bf16 %v829_v42, %v829_v42  ;;  %v763_v59 = vld [vmem:[#allocation2 + $0xb0] sm:$0xff]  ;;  %v745_v60 = vld [vmem:[#allocation2 + $0x20] sm:$0xff]  ;;  %716 = vst.msk [vmem:[#allocation2 + $0x50] sm:$0xff] %vm264_vm2, %v683_v43  ;;  %v697_v61 = vadd.f32 %v642_v54, %v321_v38  ;;  %v684_v62 = vadd.f32 %v1261_v55, %v308_v39  ;;  %v1277_v63 = vpop.f32.mrb[10].mxu1  ;;  %v581_v0 = vpop.f32.mrb[11].mxu0  ;;  %v748_v4 = vld [vmem:[#allocation2 + $0x38] sm:$0xff] }
  0xfb   : > { %992 = vst.msk [vmem:[%s1515_s30 + $0x4c] sm:$0xf] %vm972_vm4, %v1215_v48  ;;  %974 = vst.msk [vmem:[%s1515_s30 + $0x4] sm:$0xf] %vm972_vm4, %v1197_v49  ;;  %v802_v1 = vadd.f32 %v1498_v50, %v763_v59  ;;  %v784_v2 = vadd.f32 %v1498_v50, %v745_v60  ;;  %v761_v3 = vld [vmem:[#allocation2 + $0xa0] sm:$0xff]  ;;  %v700_v5 = vadd.f32 %v1277_v63, %v324_v46  ;;  %v645_v7 = vpop.f32.mrb[11].mxu1 }
  0xfc   : > { %732 = vst.msk [vmem:[#allocation2 + $0xd0] sm:$0xff] %vm264_vm2, %v699_v52  ;;  %714 = vst.msk [vmem:[#allocation2 + $0x40] sm:$0xff] %vm264_vm2, %v681_v53  ;;  %v682_v6 = vadd.f32 %v581_v0, %v306_v47  ;;  %v818_v8 = vmax.f32 %v786_v58, 0.0  ;;  %v800_v9 = vadd.f32 %v1498_v50, %v761_v3  ;;  %v787_v10 = vadd.f32 %v1498_v50, %v748_v4  ;;  %v764_v11 = vld [vmem:[#allocation2 + $0xb8] sm:$0xff]  ;;  %v746_v12 = vld [vmem:[#allocation2 + $0x28] sm:$0xff] }
  0xfd   : > { %990 = vst.msk [vmem:[%s1515_s30 + $0x44] sm:$0xf] %vm972_vm4, %v1213_v57  ;;  %v698_v13 = vadd.f32 %v645_v7, %v322_v56  ;;  %v834_v14 = vmax.f32 %v802_v1, 0.0  ;;  %v816_v15 = vmax.f32 %v784_v2, 0.0  ;;  %v803_v16 = vadd.f32 %v1498_v50, %v764_v11  ;;  %v762_v18 = vld [vmem:[#allocation2 + $0xa8] sm:$0xff]  ;;  %v325_v31 = vld [vmem:[#allocation2 + $0xe0] sm:$0xff] }
  0xfe   : > { %730 = vst.msk [vmem:[#allocation2 + $0xc0] sm:$0xff] %vm264_vm2, %v697_v61  ;;  %717 = vst.msk [vmem:[#allocation2 + $0x58] sm:$0xff] %vm264_vm2, %v684_v62  ;;  %v785_v17 = vadd.f32 %v1498_v50, %v746_v12  ;;  %v1202_v20 = vpack.c.bf16 %v818_v8, %v818_v8  ;;  %v832_v21 = vmax.f32 %v800_v9, 0.0  ;;  %v819_v22 = vmax.f32 %v787_v10, 0.0  ;;  %v1264_v30 = vpop.f32.mrb[12].mxu0  ;;  %v312_v32 = vld [vmem:[#allocation2 + $0x78] sm:$0xff] }
  0xff   : > { %733 = vst.msk [vmem:[#allocation2 + $0xd8] sm:$0xff] %vm264_vm2, %v700_v5  ;;  %715 = vst.msk [vmem:[#allocation2 + $0x48] sm:$0xff] %vm264_vm2, %v682_v6  ;;  %v801_v23 = vadd.f32 %v1498_v50, %v762_v18  ;;  %v1218_v26 = vpack.c.bf16 %v834_v14, %v834_v14  ;;  %v1200_v27 = vpack.c.bf16 %v816_v15, %v816_v15  ;;  %v835_v28 = vmax.f32 %v803_v16, 0.0  ;;  %v1280_v37 = vpop.f32.mrb[12].mxu1  ;;  %v594_v38 = vpop.f32.mrb[13].mxu0  ;;  %v328_v39 = vld [vmem:[#allocation2 + $0xf8] sm:$0xff] }
 0x100   : > { %731 = vst.msk [vmem:[#allocation2 + $0xc8] sm:$0xff] %vm264_vm2, %v698_v13  ;;  %v817_v29 = vmax.f32 %v785_v17, 0.0  ;;  %v1216_v33 = vpack.c.bf16 %v832_v21, %v832_v21  ;;  %v1203_v34 = vpack.c.bf16 %v819_v22, %v819_v22  ;;  %v687_v36 = vadd.f32 %v1264_v30, %v311_v19  ;;  %v310_v40 = vld [vmem:[#allocation2 + $0x68] sm:$0xff]  ;;  %v658_v46 = vpop.f32.mrb[13].mxu1  ;;  %v1265_v47 = vpop.f32.mrb[14].mxu0 }
 0x101   : > { %979 = vst.msk [vmem:[%s1515_s30 + $0x18] sm:$0xf] %vm972_vm4, %v1202_v20  ;;  %v833_v35 = vmax.f32 %v801_v23, 0.0  ;;  %995 = vst.msk [vmem:[%s1515_s30 + $0x58] sm:$0xf] %vm972_vm4, %v1218_v26  ;;  %v1219_v41 = vpack.c.bf16 %v835_v28, %v835_v28  ;;  %v751_v43 = vld [vmem:[#allocation2 + $0x50] sm:$0xff]  ;;  %v703_v44 = vadd.f32 %v1280_v37, %v327_v24  ;;  %v685_v45 = vadd.f32 %v594_v38, %v309_v25 }
 0x102   : > { %977 = vst.msk [vmem:[%s1515_s30 + $0x10] sm:$0xf] %vm972_vm4, %v1200_v27  ;;  %v1201_v42 = vpack.c.bf16 %v817_v29, %v817_v29  ;;  %v326_v48 = vld [vmem:[#allocation2 + $0xe8] sm:$0xff]  ;;  %993 = vst.msk [vmem:[%s1515_s30 + $0x50] sm:$0xf] %vm972_vm4, %v1216_v33  ;;  %v790_v51 = vadd.f32 %v1498_v50, %v751_v43  ;;  %v701_v54 = vadd.f32 %v658_v46, %v325_v31  ;;  %v1281_v56 = vpop.f32.mrb[14].mxu1 }
 0x103   : > { %980 = vst.msk [vmem:[%s1515_s30 + $0x1c] sm:$0xf] %vm972_vm4, %v1203_v34  ;;  %v1217_v49 = vpack.c.bf16 %v833_v35, %v833_v35  ;;  %v767_v52 = vld [vmem:[#allocation2 + $0xd0] sm:$0xff]  ;;  %v749_v53 = vld [vmem:[#allocation2 + $0x40] sm:$0xff]  ;;  %v688_v55 = vadd.f32 %v1265_v47, %v312_v32  ;;  %v597_v57 = vpop.f32.mrb[15].mxu0  ;;  %v704_v62 = vadd.f32 %v1281_v56, %v328_v39  ;;  %v661_v0 = vpop.f32.mrb[15].mxu1 }
 0x104   : > { %720 = vst.msk [vmem:[#allocation2 + $0x70] sm:$0xff] %vm264_vm2, %v687_v36  ;;  %v806_v58 = vadd.f32 %v1498_v50, %v767_v52  ;;  %v788_v59 = vadd.f32 %v1498_v50, %v749_v53  ;;  %736 = vst.msk [vmem:[#allocation2 + $0xf0] sm:$0xff] %vm264_vm2, %v703_v44  ;;  %v686_v63 = vadd.f32 %v597_v57, %v310_v40  ;;  %v822_v1 = vmax.f32 %v790_v51, 0.0 }
 0x105   : > { %996 = vst.msk [vmem:[%s1515_s30 + $0x5c] sm:$0xf] %vm972_vm4, %v1219_v41  ;;  %978 = vst.msk [vmem:[%s1515_s30 + $0x14] sm:$0xf] %vm972_vm4, %v1201_v42  ;;  %v765_v60 = vld [vmem:[#allocation2 + $0xc0] sm:$0xff]  ;;  %v752_v61 = vld [vmem:[#allocation2 + $0x58] sm:$0xff]  ;;  %v702_v6 = vadd.f32 %v661_v0, %v326_v48 }
 0x106   : > { %718 = vst.msk [vmem:[#allocation2 + $0x60] sm:$0xff] %vm264_vm2, %v685_v45  ;;  %v804_v2 = vadd.f32 %v1498_v50, %v765_v60  ;;  %v791_v3 = vadd.f32 %v1498_v50, %v752_v61  ;;  %v768_v4 = vld [vmem:[#allocation2 + $0xd8] sm:$0xff]  ;;  %v750_v5 = vld [vmem:[#allocation2 + $0x48] sm:$0xff]  ;;  %734 = vst.msk [vmem:[#allocation2 + $0xe0] sm:$0xff] %vm264_vm2, %v701_v54  ;;  %v838_v7 = vmax.f32 %v806_v58, 0.0  ;;  %v820_v8 = vmax.f32 %v788_v59, 0.0 }
 0x107   : > { %994 = vst.msk [vmem:[%s1515_s30 + $0x54] sm:$0xf] %vm972_vm4, %v1217_v49  ;;  %v807_v9 = vadd.f32 %v1498_v50, %v768_v4  ;;  %v789_v10 = vadd.f32 %v1498_v50, %v750_v5  ;;  %v766_v11 = vld [vmem:[#allocation2 + $0xc8] sm:$0xff]  ;;  %v1206_v12 = vpack.c.bf16 %v822_v1, %v822_v1 }
 0x108   : > { %721 = vst.msk [vmem:[#allocation2 + $0x78] sm:$0xff] %vm264_vm2, %v688_v55  ;;  %737 = vst.msk [vmem:[#allocation2 + $0xf8] sm:$0xff] %vm264_vm2, %v704_v62  ;;  %v836_v13 = vmax.f32 %v804_v2, 0.0  ;;  %v823_v14 = vmax.f32 %v791_v3, 0.0  ;;  %v805_v15 = vadd.f32 %v1498_v50, %v766_v11  ;;  %v1222_v16 = vpack.c.bf16 %v838_v7, %v838_v7 }
 0x109   : > { %719 = vst.msk [vmem:[#allocation2 + $0x68] sm:$0xff] %vm264_vm2, %v686_v63  ;;  %735 = vst.msk [vmem:[#allocation2 + $0xe8] sm:$0xff] %vm264_vm2, %v702_v6  ;;  %v1204_v17 = vpack.c.bf16 %v820_v8, %v820_v8  ;;  %v839_v18 = vmax.f32 %v807_v9, 0.0  ;;  %v821_v19 = vmax.f32 %v789_v10, 0.0 }
 0x10a   : > { %983 = vst.msk [vmem:[%s1515_s30 + $0x28] sm:$0xf] %vm972_vm4, %v1206_v12  ;;  %v1220_v20 = vpack.c.bf16 %v836_v13, %v836_v13  ;;  %v1207_v21 = vpack.c.bf16 %v823_v14, %v823_v14  ;;  %v837_v22 = vmax.f32 %v805_v15, 0.0  ;;  %999 = vst.msk [vmem:[%s1515_s30 + $0x68] sm:$0xf] %vm972_vm4, %v1222_v16 }
 0x10b   : > { %981 = vst.msk [vmem:[%s1515_s30 + $0x20] sm:$0xf] %vm972_vm4, %v1204_v17  ;;  %v1223_v23 = vpack.c.bf16 %v839_v18, %v839_v18  ;;  %v1205_v24 = vpack.c.bf16 %v821_v19, %v821_v19  ;;  %v755_v25 = vld [vmem:[#allocation2 + $0x70] sm:$0xff] }
 0x10c   : > { %997 = vst.msk [vmem:[%s1515_s30 + $0x60] sm:$0xf] %vm972_vm4, %v1220_v20  ;;  %984 = vst.msk [vmem:[%s1515_s30 + $0x2c] sm:$0xf] %vm972_vm4, %v1207_v21  ;;  %v1221_v26 = vpack.c.bf16 %v837_v22, %v837_v22  ;;  %v794_v27 = vadd.f32 %v1498_v50, %v755_v25  ;;  %v771_v28 = vld [vmem:[#allocation2 + $0xf0] sm:$0xff] }
 0x10d   : > { %v753_v29 = vld [vmem:[#allocation2 + $0x60] sm:$0xff]  ;;  %1000 = vst.msk [vmem:[%s1515_s30 + $0x6c] sm:$0xf] %vm972_vm4, %v1223_v23  ;;  %982 = vst.msk [vmem:[%s1515_s30 + $0x24] sm:$0xf] %vm972_vm4, %v1205_v24  ;;  %v810_v30 = vadd.f32 %v1498_v50, %v771_v28 }
 0x10e   : > { %v792_v31 = vadd.f32 %v1498_v50, %v753_v29  ;;  %v769_v32 = vld [vmem:[#allocation2 + $0xe0] sm:$0xff]  ;;  %998 = vst.msk [vmem:[%s1515_s30 + $0x64] sm:$0xf] %vm972_vm4, %v1221_v26  ;;  %v826_v34 = vmax.f32 %v794_v27, 0.0 }
 0x10f   : > { %v756_v33 = vld [vmem:[#allocation2 + $0x78] sm:$0xff]  ;;  %v808_v35 = vadd.f32 %v1498_v50, %v769_v32  ;;  %v842_v39 = vmax.f32 %v810_v30, 0.0 }
 0x110   : > { %v795_v36 = vadd.f32 %v1498_v50, %v756_v33  ;;  %v772_v37 = vld [vmem:[#allocation2 + $0xf8] sm:$0xff]  ;;  %v754_v38 = vld [vmem:[#allocation2 + $0x68] sm:$0xff]  ;;  %v824_v40 = vmax.f32 %v792_v31, 0.0  ;;  %v1210_v44 = vpack.c.bf16 %v826_v34, %v826_v34 }
 0x111   : > { %v811_v41 = vadd.f32 %v1498_v50, %v772_v37  ;;  %v793_v42 = vadd.f32 %v1498_v50, %v754_v38  ;;  %v770_v43 = vld [vmem:[#allocation2 + $0xe8] sm:$0xff]  ;;  %v840_v45 = vmax.f32 %v808_v35, 0.0  ;;  %v1226_v48 = vpack.c.bf16 %v842_v39, %v842_v39 }
 0x112   : > { %v827_v46 = vmax.f32 %v795_v36, 0.0  ;;  %v809_v47 = vadd.f32 %v1498_v50, %v770_v43  ;;  %v1208_v49 = vpack.c.bf16 %v824_v40, %v824_v40  ;;  %987 = vst.msk [vmem:[%s1515_s30 + $0x38] sm:$0xf] %vm972_vm4, %v1210_v44 }
 0x113   : > { %v843_v51 = vmax.f32 %v811_v41, 0.0  ;;  %v825_v52 = vmax.f32 %v793_v42, 0.0  ;;  %v1224_v53 = vpack.c.bf16 %v840_v45, %v840_v45  ;;  %1003 = vst.msk [vmem:[%s1515_s30 + $0x78] sm:$0xf] %vm972_vm4, %v1226_v48 }
 0x114   : > { %v1211_v54 = vpack.c.bf16 %v827_v46, %v827_v46  ;;  %v841_v55 = vmax.f32 %v809_v47, 0.0  ;;  %985 = vst.msk [vmem:[%s1515_s30 + $0x30] sm:$0xf] %vm972_vm4, %v1208_v49 }
 0x115   : > { %v1227_v56 = vpack.c.bf16 %v843_v51, %v843_v51  ;;  %v1209_v57 = vpack.c.bf16 %v825_v52, %v825_v52  ;;  %1001 = vst.msk [vmem:[%s1515_s30 + $0x70] sm:$0xf] %vm972_vm4, %v1224_v53 }
 0x116   : > { %988 = vst.msk [vmem:[%s1515_s30 + $0x3c] sm:$0xf] %vm972_vm4, %v1211_v54  ;;  %v1225_v50 = vpack.c.bf16 %v841_v55, %v841_v55 }
 0x117   : > { %1004 = vst.msk [vmem:[%s1515_s30 + $0x7c] sm:$0xf] %vm972_vm4, %v1227_v56  ;;  %986 = vst.msk [vmem:[%s1515_s30 + $0x34] sm:$0xf] %vm972_vm4, %v1209_v57 }
 0x118   : > { %1002 = vst.msk [vmem:[%s1515_s30 + $0x74] sm:$0xf] %vm972_vm4, %v1225_v50 }
 0x119 PF: > { %s13_s14 = sadd.s32 1, %s1352_s14   ;;  %s1641_s12 = smov %s1348_s13 }
 0x11a   : > { %p10_p5 = scmp.ge.s32.totalorder %s13_s14, 10   ;;  %s1642_s13 = smov %s1644_s15 }
 0x11c   :  { %12 = sbr.rel (!%p10_p5) target bundleno = 2 (0x2), region = 76 }

</bundles_post_ra>
